<compile_context>
chip_gen: v6e
topology: v6e:2x2x1
jax: 0.10.0
libtpu: 0.0.40
codegen_flags: <defaults>
</compile_context>

<pallas_src>
import functools

import jax
import jax.numpy as jnp
from jax.experimental import pallas as pl
from jax.experimental.pallas import tpu as pltpu


def distmult_kernel(src_ref, rel_ref, ent_t_ref, scores_ref):
    # src_ref/rel_ref : [TB, Dp] bf16
    # ent_t_ref       : [Dp, Ep] bf16 (entity table, transposed, zero-padded)
    # scores_ref      : [TB, Ep] f32
    # q = source_emb * relation_emb, computed in f32 (v5e-friendly), bf16 for MXU.
    q = (src_ref[...].astype(jnp.float32)
         * rel_ref[...].astype(jnp.float32)).astype(jnp.bfloat16)    # [TB, Dp]
    # Real MXU matmul: [TB, Dp] x [Dp, Ep] -> [TB, Ep], f32 accumulation.
    scores_ref[...] = jnp.dot(q, ent_t_ref[...],
                              preferred_element_type=jnp.float32)


@functools.partial(jax.jit, static_argnames=("block_b",))
def distmult_forward(entities_emb, relations_emb, s, r, candidates, labels,
                     block_b=128):
    """DistMult forward, is_train=True.

    entities_emb : [E_pad, D_pad] bf16 (zero-padded rows/cols, padding_idx zeroed)
    relations_emb: [R+1, D_pad]   bf16
    Returns (scores [B, C] f32, loss scalar f32)  — matching torch semantics.
    """
    B, C = candidates.shape
    Ep, Dp = entities_emb.shape
    tb = min(block_b, B)
    assert B % tb == 0, "batch must be divisible by the batch tile"
    nb = B // tb

    # Cheap wrapper-side row gathers (only [B, Dp] streams); XLA overlaps them
    # with the kernel thanks to the cost estimate.
    src = jnp.take(entities_emb, s, axis=0)            # [B, Dp] bf16
    rel = jnp.take(relations_emb, r, axis=0)           # [B, Dp] bf16
    ent_t = entities_emb.T                             # [Dp, Ep] bf16 (one tiny transpose)

    # VMEM budget from the real double-buffered tile footprint (+2x headroom),
    # capped below v7x's 64 MiB physical VMEM.
    tile_bytes = 2 * (2 * tb * Dp * 2      # src + rel tiles (bf16)
                      + Dp * Ep * 2        # entity table (bf16)
                      + tb * Ep * 4)       # scores tile (f32)
    vmem_limit = int(min(max(2 * tile_bytes, 16 * 1024 * 1024), 48 * 1024 * 1024))

    cost = pl.CostEstimate(
        flops=2 * B * Dp * Ep,
        transcendentals=0,
        bytes_accessed=2 * B * Dp * 2 + nb * Dp * Ep * 2 + B * Ep * 4,
    )

    grid_spec = pltpu.PrefetchScalarGridSpec(
        num_scalar_prefetch=0,
        grid=(nb,),
        in_specs=[
            pl.BlockSpec((tb, Dp), lambda i: (i, 0)),   # src rows
            pl.BlockSpec((tb, Dp), lambda i: (i, 0)),   # rel rows
            pl.BlockSpec((Dp, Ep), lambda i: (0, 0)),   # entity table (resident)
        ],
        out_specs=pl.BlockSpec((tb, Ep), lambda i: (i, 0)),  # lane-dense f32 scores
    )

    scores_full = pl.pallas_call(
        distmult_kernel,
        out_shape=jax.ShapeDtypeStruct((B, Ep), jnp.float32),
        grid_spec=grid_spec,
        compiler_params=pltpu.CompilerParams(
            dimension_semantics=("parallel",),
            vmem_limit_bytes=vmem_limit),
        cost_estimate=cost,
    )(src, rel, ent_t)

    # Candidate-column pick + cross-entropy on the tiny [B, C] result (XLA side).
    scores = jnp.take_along_axis(scores_full, candidates.astype(jnp.int32), axis=1)
    logp = jax.nn.log_softmax(scores, axis=-1)
    tgt = jnp.take_along_axis(logp, labels.reshape(B, 1).astype(jnp.int32), axis=1)
    loss = -jnp.mean(tgt)                       # torch cross_entropy default: mean over batch
    return scores, loss


def xavier_uniform(key, shape, dtype=jnp.float32):
    # nn.init.xavier_uniform_ on an Embedding weight [num_embeddings, dim].
    fan_out, fan_in = shape
    limit = (6.0 / (fan_in + fan_out)) ** 0.5
    return jax.random.uniform(key, shape, dtype, minval=-limit, maxval=limit)


if __name__ == "__main__":
    # Small, module-consistent sizes.
    entity_count = 50      # train_graph.ent_vocab_size
    relation_count = 10    # train_graph.rel_vocab_size
    dim = 100              # DistMult default embedding dim
    dim_pad = 128          # lane-aligned embedding dim (zero pad columns)
    ent_pad = 128          # lane-aligned entity-vocab pad (zero pad rows)
    B, C = 256, 64         # batch, candidates per example -> 2 batch tiles of 128

    key = jax.random.PRNGKey(0)
    k_ent, k_rel, k_s, k_r, k_cand, k_lab = jax.random.split(key, 6)

    # Embedding tables: xavier init at the module's dim, padding_idx row zeroed,
    # then zero-padded to (ent_pad, dim_pad) and cast to bf16.
    ent = xavier_uniform(k_ent, (entity_count + 1, dim))
    ent = ent.at[entity_count].set(0.0)                       # nn.Embedding padding_idx
    relw = xavier_uniform(k_rel, (relation_count + 1, dim))
    relw = relw.at[relation_count].set(0.0)
    entities_emb = jnp.pad(
        ent, ((0, ent_pad - (entity_count + 1)), (0, dim_pad - dim))).astype(jnp.bfloat16)
    relations_emb = jnp.pad(relw, ((0, 0), (0, dim_pad - dim))).astype(jnp.bfloat16)

    s = jax.random.randint(k_s, (B,), 0, entity_count, dtype=jnp.int32)
    r = jax.random.randint(k_r, (B,), 0, relation_count, dtype=jnp.int32)
    candidates = jax.random.randint(k_cand, (B, C), 0, entity_count, dtype=jnp.int32)
    labels = jax.random.randint(k_lab, (B,), 0, C, dtype=jnp.int32)

    scores, loss = distmult_forward(entities_emb, relations_emb, s, r, candidates, labels)
    jax.block_until_ready((scores, loss))

    # Pure-JAX reference (same bf16 quantization, f32 accumulation), using the
    # original [B, C, D] gather formulation.
    src_bf = jnp.take(entities_emb, s, axis=0)
    rel_bf = jnp.take(relations_emb, r, axis=0)
    q_ref = (src_bf.astype(jnp.float32) * rel_bf.astype(jnp.float32)).astype(jnp.bfloat16)
    cand_bf = jnp.take(entities_emb, candidates, axis=0)                     # [B, C, Dp]
    ref_scores = jnp.einsum('bcd,bd->bc', cand_bf.astype(jnp.float32),
                            q_ref.astype(jnp.float32))
    ref_logp = jax.nn.log_softmax(ref_scores, axis=-1)
    ref_loss = -jnp.mean(ref_logp[jnp.arange(B), labels])

    assert jnp.allclose(scores, ref_scores, atol=1e-3, rtol=1e-2), (
        float(jnp.max(jnp.abs(scores - ref_scores))))
    assert jnp.allclose(loss, ref_loss, atol=1e-3, rtol=1e-3), (float(loss), float(ref_loss))

    print("KERNEL_OK")
</pallas_src>

<mosaic_0001>
module attributes {stable_mosaic.version = 11 : i64} {
  func.func @distmult_kernel(%arg0: i32, %arg1: memref<128x128xbf16, #tpu.memory_space<vmem>>, %arg2: memref<128x128xbf16, #tpu.memory_space<vmem>>, %arg3: memref<128x128xbf16, #tpu.memory_space<vmem>>, %arg4: memref<128x128xf32, #tpu.memory_space<vmem>>) attributes {dimension_semantics = [#tpu.dimension_semantics<parallel>], iteration_bounds = array<i64: 2>, scalar_prefetch = 0 : i64, scratch_operands = 0 : i64, tpu.core_type = #tpu.core_type<tc>, window_params = [{transform_indices = @transform_0, window_bounds = array<i64: 128, 128>}, {transform_indices = @transform_1, window_bounds = array<i64: 128, 128>}, {pipeline_mode = #tpu.pipeline_mode<synchronous>, transform_indices = @transform_2, window_bounds = array<i64: 128, 128>}, {transform_indices = @transform_3, window_bounds = array<i64: 128, 128>}]} {
    %c0 = arith.constant 0 : index
    %c0_0 = arith.constant 0 : index
    %0 = vector.load %arg1[%c0, %c0_0] : memref<128x128xbf16, #tpu.memory_space<vmem>>, vector<128x128xbf16>
    %1 = arith.extf %0 : vector<128x128xbf16> to vector<128x128xf32>
    %c0_1 = arith.constant 0 : index
    %c0_2 = arith.constant 0 : index
    %2 = vector.load %arg2[%c0_1, %c0_2] : memref<128x128xbf16, #tpu.memory_space<vmem>>, vector<128x128xbf16>
    %3 = arith.extf %2 : vector<128x128xbf16> to vector<128x128xf32>
    %4 = arith.mulf %1, %3 : vector<128x128xf32>
    %5 = arith.truncf %4 : vector<128x128xf32> to vector<128x128xbf16>
    %c0_3 = arith.constant 0 : index
    %c0_4 = arith.constant 0 : index
    %6 = vector.load %arg3[%c0_3, %c0_4] : memref<128x128xbf16, #tpu.memory_space<vmem>>, vector<128x128xbf16>
    %cst = arith.constant dense<0.000000e+00> : vector<128x128xf32>
    %7 = tpu.matmul %5, %6, %cst {dimension_numbers = #tpu.dot_dimension_numbers<[1], [0], [0], [1], [0, 0, 1, 1], [], []>} : vector<128x128xbf16>, vector<128x128xbf16>, vector<128x128xf32> -> vector<128x128xf32>
    %c0_5 = arith.constant 0 : index
    %c0_6 = arith.constant 0 : index
    %8 = vector.load %arg4[%c0_5, %c0_6] : memref<128x128xf32, #tpu.memory_space<vmem>>, vector<128x128xf32>
    tpu.vector_store %arg4[%c0_5, %c0_6], %7 {strides = array<i32>} : memref<128x128xf32, #tpu.memory_space<vmem>>, vector<128x128xf32>,
    return
  }
  func.func @transform_0(%arg0: i32) -> (i32, i32) {
    %c0_i32 = arith.constant 0 : i32
    %c0_i32_0 = arith.constant 0 : i32
    return %arg0, %c0_i32 : i32, i32
  }
  func.func @transform_1(%arg0: i32) -> (i32, i32) {
    %c0_i32 = arith.constant 0 : i32
    %c0_i32_0 = arith.constant 0 : i32
    return %arg0, %c0_i32 : i32, i32
  }
  func.func @transform_2(%arg0: i32) -> (i32, i32) {
    %c0_i32 = arith.constant 0 : i32
    %c0_i32_0 = arith.constant 0 : i32
    %c0_i32_1 = arith.constant 0 : i32
    return %c0_i32, %c0_i32_0 : i32, i32
  }
  func.func @transform_3(%arg0: i32) -> (i32, i32) {
    %c0_i32 = arith.constant 0 : i32
    %c0_i32_0 = arith.constant 0 : i32
    return %arg0, %c0_i32 : i32, i32
  }
}

</mosaic_0001>

<bundles_post_ra>
// kernel: distmult_forward.1
= control target key start
LH: loop header
LB: loop body
LE: loop exit
PB: predicated region body
PF: predicated region fallthrough
CT: control target
= control target key end

     0   :  { %s737_s12 = smov 0   ;;  %s823_s0 = inlined_call_operand.vmem [shape: bf16[256,128], index: 0, kind: input, shape index: {}]   ;;  %s824_s1 = inlined_call_operand.vmem [shape: bf16[256,128], index: 1, kind: input, shape index: {}]   ;;  %s825_s2 = inlined_call_operand.vmem [shape: bf16[128,128], index: 2, kind: input, shape index: {}]   ;;  %s826_s3 = inlined_call_operand.vmem [shape: f32[256,128], index: 3, kind: output, shape index: {}]  }
   0x1 LB: > { %s530_s13 = sadd.s32 4294967295, %s715_s12   ;;  %p534_p0 = scmp.ge.s32.totalorder %s715_s12, 1  ;;  %s715_s12 = sphi %s737_s12, %s13_s12  }
   0x2   : > { %p149_p1 = scmp.lt.s32.totalorder %s715_s12, 3 }
   0x4   : > { %p150_p2 = pnand %p534_p0, %p149_p1 }
   0x5   : > { %s535_s16 = sshll.u32 (!%p150_p2), %s530_s13, 4 }
   0x6   : > { %153 = sbr.rel (%p150_p2) target bundleno = 252 (0xfc), region = 32  ;;  %p179_p3 = scmp.lt.s32.totalorder (!%p150_p2), %s535_s16, 31 }
   0xb   : > { %v701_v0 = vld [vmem:[%s825_s2 + $0x38] sm:$0xff]   ;;  %v702_v1 = vld [vmem:[%s825_s2 + $0x30] sm:$0xff]   ;;  %s828_s16 = smov (!%p179_p3, %s535_s16), 31  ;;  %v703_v2 = vld [vmem:[%s825_s2 + $0x28] sm:$0xff]  }
   0xc   : > { %645 = vmatprep.subr.bf16.mxu0 %v701_v0  ;;  %677 = vmatprep.subr.bf16.mxu1 %v701_v0  ;;  %s536_s21 = sshll.u32 %s828_s16, 2  ;;  %v704_v3 = vld [vmem:[%s825_s2 + $0x20] sm:$0xff]   ;;  %v705_v18 = vld [vmem:[%s825_s2 + $0x18] sm:$0xff]   ;;  %v706_v25 = vld [vmem:[%s825_s2 + $0x10] sm:$0xff]   ;;  %s540_s11 = sshll.u32 %s828_s16, 3 }
   0xd   : > { %646 = vmatpush3.bf16.msra.mxu0 %v701_v0  ;;  %685 = vmatpush3.bf16.msra.mxu1 %v701_v0  ;;  %s760_s24 = scalar_lea.vmem %s823_s0, %s536_s21  ;;  %s765_s27 = scalar_lea.vmem %s824_s1, %s536_s21  ;;  %v707_v34 = vld [vmem:[%s825_s2 + $0x8] sm:$0xff]   ;;  %v708_v50 = vld [vmem:[%s825_s2] sm:$0xff]  }
   0xe   : > { %647 = vmatprep.subr.bf16.mxu0 %v702_v1  ;;  %678 = vmatprep.subr.bf16.mxu1 %v702_v1  ;;  %v552_v4 = vld [vmem:[%s760_s24] sm:$0xff]   ;;  %v615_v23 = vld [vmem:[%s760_s24 + $0x8] sm:$0xff]   ;;  %v616_v32 = vld [vmem:[%s760_s24 + $0x10] sm:$0xff]   ;;  %s802_s15 = scalar_lea.vmem %s826_s3, %s540_s11 }
   0xf   : > { %v584_v5 = vld [vmem:[%s765_s27] sm:$0xff]   ;;  %v553_v7 = vunpack.c.l.bf16 %v552_v4  ;;  %v554_v8 = vunpack.c.h.bf16 %v552_v4  ;;  %v622_v24 = vld [vmem:[%s765_s27 + $0x8] sm:$0xff]   ;;  %v557_v26 = vunpack.c.l.bf16 %v615_v23  ;;  %v558_v30 = vunpack.c.h.bf16 %v615_v23  ;;  %v623_v33 = vld [vmem:[%s765_s27 + $0x10] sm:$0xff]  }
  0x10   : > { %v618_v6 = vld [vmem:[%s760_s24 + $0x20] sm:$0xff]   ;;  %v585_v9 = vunpack.c.l.bf16 %v584_v5  ;;  %v586_v10 = vunpack.c.h.bf16 %v584_v5  ;;  %v589_v27 = vunpack.c.l.bf16 %v622_v24  ;;  %v619_v28 = vld [vmem:[%s760_s24 + $0x28] sm:$0xff]   ;;  %v590_v31 = vunpack.c.h.bf16 %v622_v24  ;;  %v620_v39 = vld [vmem:[%s760_s24 + $0x30] sm:$0xff]  }
  0x11   : > { %648 = vmatpush3.bf16.msra.mxu0 %v702_v1  ;;  %686 = vmatpush3.bf16.msra.mxu1 %v702_v1  ;;  %v625_v11 = vld [vmem:[%s765_s27 + $0x20] sm:$0xff]   ;;  %v569_v12 = vunpack.c.l.bf16 %v618_v6  ;;  %v570_v13 = vunpack.c.h.bf16 %v618_v6  ;;  %v626_v29 = vld [vmem:[%s765_s27 + $0x28] sm:$0xff]   ;;  %v573_v35 = vunpack.c.l.bf16 %v619_v28  ;;  %v574_v36 = vunpack.c.h.bf16 %v619_v28  ;;  %v627_v40 = vld [vmem:[%s765_s27 + $0x30] sm:$0xff]  }
  0x12   : > { %649 = vmatprep.subr.bf16.mxu0 %v703_v2  ;;  %679 = vmatprep.subr.bf16.mxu1 %v703_v2  ;;  %v601_v14 = vunpack.c.l.bf16 %v625_v11  ;;  %v602_v15 = vunpack.c.h.bf16 %v625_v11  ;;  %v261_v16 = vmul.f32 %v585_v9, %v553_v7  ;;  %v262_v17 = vmul.f32 %v586_v10, %v554_v8  ;;  %v617_v55 = vld [vmem:[%s760_s24 + $0x18] sm:$0xff]  }
  0x13   : > { %v605_v37 = vunpack.c.l.bf16 %v626_v29  ;;  %v606_v38 = vunpack.c.h.bf16 %v626_v29  ;;  %v263_v41 = vmul.f32 %v589_v27, %v557_v26  ;;  %v561_v42 = vunpack.c.l.bf16 %v616_v32  ;;  %v624_v56 = vld [vmem:[%s765_s27 + $0x18] sm:$0xff]  }
  0x14   : > { %v269_v19 = vmul.f32 %v601_v14, %v569_v12  ;;  %v270_v20 = vmul.f32 %v602_v15, %v570_v13  ;;  %v277_v21 = vpack.c.bf16 %v262_v17, %v261_v16  ;;  %v562_v43 = vunpack.c.h.bf16 %v616_v32  ;;  %v621_v60 = vld [vmem:[%s760_s24 + $0x38] sm:$0xff]  }
  0x15   : > { %650 = vmatpush3.bf16.msra.mxu0 %v703_v2  ;;  %687 = vmatpush3.bf16.msra.mxu1 %v703_v2  ;;  %v593_v44 = vunpack.c.l.bf16 %v623_v33  ;;  %v594_v45 = vunpack.c.h.bf16 %v623_v33  ;;  %v577_v46 = vunpack.c.l.bf16 %v620_v39  ;;  %v578_v47 = vunpack.c.h.bf16 %v620_v39  ;;  %v628_v61 = vld [vmem:[%s765_s27 + $0x38] sm:$0xff]  }
  0x16   : > { %651 = vmatprep.subr.bf16.mxu0 %v704_v3  ;;  %680 = vmatprep.subr.bf16.mxu1 %v704_v3  ;;  %v281_v22 = vpack.c.bf16 %v270_v20, %v269_v19  ;;  %v609_v48 = vunpack.c.l.bf16 %v627_v40  ;;  %v610_v49 = vunpack.c.h.bf16 %v627_v40  ;;  %v264_v51 = vmul.f32 %v590_v31, %v558_v30 }
  0x17   : > { %661 = vmatprep.mubr.bf16.mxu0 %v277_v21  ;;  %v271_v52 = vmul.f32 %v605_v37, %v573_v35  ;;  %v272_v53 = vmul.f32 %v606_v38, %v574_v36  ;;  %v265_v54 = vmul.f32 %v593_v44, %v561_v42  ;;  %v266_v57 = vmul.f32 %v594_v45, %v562_v43 }
  0x18   : > { %669 = vmatprep.mubr.bf16.mxu1 %v281_v22  ;;  %v273_v58 = vmul.f32 %v609_v48, %v577_v46  ;;  %v274_v59 = vmul.f32 %v610_v49, %v578_v47  ;;  %v278_v62 = vpack.c.bf16 %v264_v51, %v263_v41  ;;  %v565_v0 = vunpack.c.l.bf16 %v617_v55 }
  0x19   : > { %652 = vmatpush3.bf16.msra.mxu0 %v704_v3  ;;  %688 = vmatpush3.bf16.msra.mxu1 %v704_v3  ;;  %v282_v63 = vpack.c.bf16 %v272_v53, %v271_v52  ;;  %v566_v1 = vunpack.c.h.bf16 %v617_v55  ;;  %v597_v2 = vunpack.c.l.bf16 %v624_v56  ;;  %v598_v3 = vunpack.c.h.bf16 %v624_v56 }
  0x1a   : > { %653 = vmatprep.subr.bf16.mxu0 %v705_v18  ;;  %681 = vmatprep.subr.bf16.mxu1 %v705_v18  ;;  %v581_v4 = vunpack.c.l.bf16 %v621_v60  ;;  %v582_v5 = vunpack.c.h.bf16 %v621_v60  ;;  %v613_v6 = vunpack.c.l.bf16 %v628_v61  ;;  %v614_v7 = vunpack.c.h.bf16 %v628_v61 }
  0x1b   : > { %v279_v8 = vpack.c.bf16 %v266_v57, %v265_v54  ;;  %v283_v9 = vpack.c.bf16 %v274_v59, %v273_v58  ;;  %v267_v10 = vmul.f32 %v597_v2, %v565_v0  ;;  %v268_v11 = vmul.f32 %v598_v3, %v566_v1 }
  0x1c   : > { %v275_v12 = vmul.f32 %v613_v6, %v581_v4  ;;  %v276_v13 = vmul.f32 %v614_v7, %v582_v5 }
  0x1d   : > { %654 = vmatpush3.bf16.msra.mxu0 %v705_v18  ;;  %689 = vmatpush3.bf16.msra.mxu1 %v705_v18  ;;  %v280_v14 = vpack.c.bf16 %v268_v11, %v267_v10 }
  0x1e   : > { %655 = vmatprep.subr.bf16.mxu0 %v706_v25  ;;  %682 = vmatprep.subr.bf16.mxu1 %v706_v25  ;;  %v284_v15 = vpack.c.bf16 %v276_v13, %v275_v12 }
  0x21   : > { %656 = vmatpush3.bf16.msra.mxu0 %v706_v25  ;;  %690 = vmatpush3.bf16.msra.mxu1 %v706_v25 }
  0x22   : > { %657 = vmatprep.subr.bf16.mxu0 %v707_v34  ;;  %683 = vmatprep.subr.bf16.mxu1 %v707_v34 }
  0x25   : > { %658 = vmatpush3.bf16.msra.mxu0 %v707_v34  ;;  %691 = vmatpush3.bf16.msra.mxu1 %v707_v34 }
  0x26   : > { %659 = vmatprep.subr.bf16.mxu0 %v708_v50  ;;  %684 = vmatprep.subr.bf16.mxu1 %v708_v50 }
  0x29   : > { %660 = vmatpush3.bf16.msra.mxu0 %v708_v50  ;;  %692 = vmatpush3.bf16.msra.mxu1 %v708_v50 }
  0x2c   : > { %662 = vmatmul.mubr.bf16.vlgmr.msra.gmra.mxu0 %v278_v62  ;;  %670 = vmatmul.mubr.bf16.vlgmr.msra.gmra.mxu1 %v282_v63 }
  0x2d   : > { %665 = vmatprep.mubr.bf16.mxu0 %v279_v8  ;;  %673 = vmatprep.mubr.bf16.mxu1 %v283_v9 }
  0x34   : > { %666 = vmatmul.mubr.bf16.gmra.mxu0 %v280_v14  ;;  %674 = vmatmul.mubr.bf16.gmra.mxu1 %v284_v15 }
  0xec   : > { %v663_v16 = vpop.f32.mrf.mxu0  ;;  %v671_v17 = vpop.f32.mrf.mxu1 }
  0xed   : > { %448 = vst [vmem:[%s802_s15 + $0x10] sm:$0xff] %v663_v16  ;;  %456 = vst [vmem:[%s802_s15 + $0x50] sm:$0xff] %v671_v17 }
  0xee   : > { %v383_v18 = vpop.f32.mrf.mxu0  ;;  %v415_v19 = vpop.f32.mrf.mxu1 }
  0xef   : > { %446 = vst [vmem:[%s802_s15] sm:$0xff] %v383_v18  ;;  %454 = vst [vmem:[%s802_s15 + $0x40] sm:$0xff] %v415_v19 }
  0xf0   : > { %v664_v20 = vpop.f32.mrf.mxu0  ;;  %v672_v21 = vpop.f32.mrf.mxu1 }
  0xf1   : > { %449 = vst [vmem:[%s802_s15 + $0x18] sm:$0xff] %v664_v20  ;;  %457 = vst [vmem:[%s802_s15 + $0x58] sm:$0xff] %v672_v21 }
  0xf2   : > { %v386_v22 = vpop.f32.mrf.mxu0  ;;  %v418_v23 = vpop.f32.mrf.mxu1 }
  0xf3   : > { %447 = vst [vmem:[%s802_s15 + $0x8] sm:$0xff] %v386_v22  ;;  %455 = vst [vmem:[%s802_s15 + $0x48] sm:$0xff] %v418_v23 }
  0xf4   : > { %v667_v24 = vpop.f32.mrf.mxu0  ;;  %v675_v25 = vpop.f32.mrf.mxu1 }
  0xf5   : > { %452 = vst [vmem:[%s802_s15 + $0x30] sm:$0xff] %v667_v24  ;;  %460 = vst [vmem:[%s802_s15 + $0x70] sm:$0xff] %v675_v25 }
  0xf6   : > { %v399_v26 = vpop.f32.mrf.mxu0  ;;  %v431_v27 = vpop.f32.mrf.mxu1 }
  0xf7   : > { %450 = vst [vmem:[%s802_s15 + $0x20] sm:$0xff] %v399_v26  ;;  %458 = vst [vmem:[%s802_s15 + $0x60] sm:$0xff] %v431_v27 }
  0xf8   : > { %v668_v28 = vpop.f32.mrf.mxu0  ;;  %v676_v29 = vpop.f32.mrf.mxu1 }
  0xf9   : > { %453 = vst [vmem:[%s802_s15 + $0x38] sm:$0xff] %v668_v28  ;;  %461 = vst [vmem:[%s802_s15 + $0x78] sm:$0xff] %v676_v29 }
  0xfa   : > { %v402_v30 = vpop.f32.mrf.mxu0  ;;  %v434_v31 = vpop.f32.mrf.mxu1 }
  0xfb   : > { %451 = vst [vmem:[%s802_s15 + $0x28] sm:$0xff] %v402_v30  ;;  %459 = vst [vmem:[%s802_s15 + $0x68] sm:$0xff] %v434_v31 }
  0xfc PF: > { %s13_s12 = sadd.s32 1, %s715_s12  }
  0xfd   : > { %p10_p4 = scmp.ge.s32.totalorder %s13_s12, 4  }
  0xff   :  { %12 = sbr.rel (!%p10_p4) target bundleno = 1 (0x1), region = 65 }

</bundles_post_ra>
